<compile_context>
chip_gen: v6e
topology: v6e:2x2x1
jax: 0.10.0
libtpu: 0.0.40
codegen_flags: <defaults>
</compile_context>

<pallas_src>
import functools

import jax
import jax.numpy as jnp
from jax import lax
from jax.experimental import pallas as pl
from jax.experimental.pallas import tpu as pltpu

_LANE = 128
_MAX_TILE_ROWS = 2048          # 2048*128*4 B = 1 MiB per f32 input per buffer
_ACC_ROWS_CANDIDATES = (256, 128, 64, 32, 16, 8)
_NUM_CORE_SPLITS = 2           # leading "parallel" axis (v7x has 2 TCs/chip)
_VMEM_LIMIT_BYTES = 32 * 1024 * 1024


def _round_up(x, m):
    return ((x + m - 1) // m) * m


def _sublane_multiple(dtype):
    """Native sublane packing multiple: 8 for 32-bit, 16 for 16-bit, 32 for 8-bit."""
    return 8 * max(1, 4 // jnp.dtype(dtype).itemsize)


def _make_kernel(beta, tile_rows, acc_rows, num_preds, rem_rows):
    """Per-core streaming accumulation of sum_p sum(smooth_l1(pred_p, target)).

    Writes each core's scalar partial sum to its (1,1,1) output block on the
    last step of the (core-local) reduction axis.
    """
    beta = float(beta)
    use_l1 = beta <= 0.0                      # torch: beta==0 -> L1
    half_inv_beta = 0.0 if use_l1 else 0.5 / beta
    half_beta = 0.5 * beta
    folds = tile_rows // acc_rows
    # Only a partial Pallas boundary block (ragged last tile) needs masking;
    # the zero-padded region of the slab contributes exactly zero loss.
    needs_mask = rem_rows != tile_rows

    def elem_loss(p_ref, tgt):
        d = p_ref[...].astype(jnp.float32) - tgt
        ad = jnp.abs(d)
        if use_l1:
            return ad
        # Folded constants: 2 vmuls instead of 3 (no f32 FMA on the VPU).
        return jnp.where(ad < beta, (half_inv_beta * d) * d, ad - half_beta)

    def partial_sum(pred_refs, t_ref, valid_rows):
        """Sum of per-element losses for this tile, folded to (acc_rows, 128)."""
        tgt = t_ref[...].astype(jnp.float32)            # (1, tile_rows, 128)
        out = jnp.zeros((acc_rows, _LANE), jnp.float32)
        keep = None
        if valid_rows is not None:
            # Row-level mask (whole 128-lane rows), only on the last step of a
            # ragged tiling.  Select: garbage/NaN beyond the block never leaks.
            row = lax.broadcasted_iota(jnp.int32, (1, tile_rows, _LANE), 1)
            keep = row < valid_rows
        for p_ref in pred_refs:
            val = elem_loss(p_ref, tgt)                 # (1, tile_rows, 128)
            if keep is not None:
                val = jnp.where(keep, val, 0.0)
            # Fold into the fixed-size accumulator slab: sublane-aligned
            # reshape + leading-axis sum == pure VALU adds, no XLU.
            out = out + val.reshape(folds, acc_rows, _LANE).sum(axis=0)
        return out

    def kernel(*refs):
        pred_refs = refs[:num_preds]
        t_ref = refs[num_preds]
        out_ref = refs[num_preds + 1]
        acc_ref = refs[num_preds + 2]

        step = pl.program_id(1)
        last = pl.num_programs(1) - 1

        @pl.when(step == 0)
        def _():
            acc_ref[...] = jnp.zeros_like(acc_ref)

        if needs_mask:
            # Unmasked fast path for all steps but the last; masked last step.
            @pl.when(step != last)
            def _():
                acc_ref[...] += partial_sum(pred_refs, t_ref, None)

            @pl.when(step == last)
            def _():
                acc_ref[...] += partial_sum(pred_refs, t_ref, rem_rows)
        else:
            acc_ref[...] += partial_sum(pred_refs, t_ref, None)

        @pl.when(step == last)
        def _():
            # Single cross-lane/sublane reduce per core, once.
            out_ref[...] = jnp.sum(acc_ref[...]).reshape(1, 1, 1)

    return kernel


@functools.partial(jax.jit, static_argnames=("beta", "max_tile_rows"))
def _fused_smooth_l1(preds, targets, beta, max_tile_rows):
    """(sum_p sum(smooth_l1(preds[p], targets))) / n  ==  sum_p mean(...)."""
    n = targets.size
    num_preds = len(preds)

    # Dtype-aware alignment so packed (bf16/int8) sublane layouts stay whole;
    # factor _NUM_CORE_SPLITS so the row count splits exactly across cores.
    sub = max(_sublane_multiple(x.dtype) for x in preds + (targets,))
    pad_align = _NUM_CORE_SPLITS * sub * _LANE
    padded = _round_up(n, pad_align)
    rows_per_core = (padded // _LANE) // _NUM_CORE_SPLITS

    tile_rows = min(int(max_tile_rows), rows_per_core)
    steps = pl.cdiv(rows_per_core, tile_rows)
    rem_rows = rows_per_core - (steps - 1) * tile_rows
    acc_rows = next(c for c in _ACC_ROWS_CANDIDATES if tile_rows % c == 0)

    def prep(x):
        flat = x.reshape(-1)
        if flat.size != padded:
            # Zero pad: both pred and target padded with 0 -> d = 0 -> zero
            # loss contribution, so no element mask is needed in the kernel.
            flat = jnp.pad(flat, (0, padded - flat.size))
        # Free, contiguous reshape to a lane-dense per-core slab.
        return flat.reshape(_NUM_CORE_SPLITS, rows_per_core, _LANE)

    slabs = [prep(p) for p in preds] + [prep(targets)]

    block = pl.BlockSpec((1, tile_rows, _LANE), lambda c, i: (c, i, 0))

    partials = pl.pallas_call(
        _make_kernel(beta, tile_rows, acc_rows, num_preds, rem_rows),
        out_shape=jax.ShapeDtypeStruct((_NUM_CORE_SPLITS, 1, 1), jnp.float32),
        grid_spec=pltpu.PrefetchScalarGridSpec(
            num_scalar_prefetch=0,
            grid=(_NUM_CORE_SPLITS, steps),
            in_specs=[block] * (num_preds + 1),
            out_specs=pl.BlockSpec((1, 1, 1), lambda c, i: (c, 0, 0)),
            scratch_shapes=[pltpu.VMEM((acc_rows, _LANE), jnp.float32)],
        ),
        compiler_params=pltpu.CompilerParams(
            # Leading axis sharded across TensorCores (2x on v7x, no-op on
            # 1-TC v5e/v6e); trailing axis is the resident-output reduction.
            dimension_semantics=("parallel", "arbitrary"),
            vmem_limit_bytes=_VMEM_LIMIT_BYTES,
        ),
    )(*slabs)

    return jnp.sum(partials) / jnp.float32(n)


def smooth_l1_loss(inputs, targets, beta=1.0, max_tile_rows=_MAX_TILE_ROWS):
    """JAX/Pallas equivalent of Smooth_L1_Loss.forward."""
    preds = (inputs["rgb_coarse"],)
    if "rgb_fine" in inputs:
        preds = preds + (inputs["rgb_fine"],)
    # Fused: one kernel launch, `targets` read from HBM once.
    return _fused_smooth_l1(preds, targets, beta=float(beta),
                            max_tile_rows=int(max_tile_rows))


if __name__ == "__main__":
    key = jax.random.PRNGKey(0)
    k1, k2, k3 = jax.random.split(key, 3)

    def ref_smooth_l1(a, b, beta=1.0):
        d = a.astype(jnp.float32) - b.astype(jnp.float32)
        ad = jnp.abs(d)
        if beta > 0.0:
            per = jnp.where(ad < beta, 0.5 * d * d / beta, ad - 0.5 * beta)
        else:
            per = ad
        return jnp.mean(per)

    # NeRF-style ray batch: (batch, rays, rgb)
    shape = (2, 64, 3)
    rgb_coarse = jax.random.uniform(k1, shape, dtype=jnp.float32, minval=-2.0, maxval=2.0)
    rgb_fine = jax.random.uniform(k2, shape, dtype=jnp.float32, minval=-2.0, maxval=2.0)
    targets = jax.random.uniform(k3, shape, dtype=jnp.float32)

    # Both coarse + fine (fused path).
    inputs = {"rgb_coarse": rgb_coarse, "rgb_fine": rgb_fine}
    loss = jax.block_until_ready(smooth_l1_loss(inputs, targets))
    ref = ref_smooth_l1(rgb_coarse, targets) + ref_smooth_l1(rgb_fine, targets)
    assert jnp.allclose(loss, ref, rtol=1e-5, atol=1e-6), (loss, ref)

    # Coarse-only branch.
    loss_c = jax.block_until_ready(smooth_l1_loss({"rgb_coarse": rgb_coarse}, targets))
    ref_c = ref_smooth_l1(rgb_coarse, targets)
    assert jnp.allclose(loss_c, ref_c, rtol=1e-5, atol=1e-6), (loss_c, ref_c)

    # Non-default beta + ragged size (exercises the zero-pad path).
    shape2 = (5, 7, 3)  # 105 elements, not a multiple of 128
    a2 = jax.random.uniform(k1, shape2, dtype=jnp.float32, minval=-3.0, maxval=3.0)
    t2 = jax.random.uniform(k2, shape2, dtype=jnp.float32)
    loss2 = jax.block_until_ready(smooth_l1_loss({"rgb_coarse": a2}, t2, beta=0.5))
    ref2 = ref_smooth_l1(a2, t2, beta=0.5)
    assert jnp.allclose(loss2, ref2, rtol=1e-5, atol=1e-6), (loss2, ref2)

    # Multi-step pipeline + masked (partial) last block + two preds, kept small
    # by shrinking max_tile_rows.
    shape3 = (14, 128, 3)
    a3 = jax.random.uniform(k1, shape3, dtype=jnp.float32, minval=-2.0, maxval=2.0)
    b3 = jax.random.uniform(k2, shape3, dtype=jnp.float32, minval=-2.0, maxval=2.0)
    t3 = jax.random.uniform(k3, shape3, dtype=jnp.float32)
    loss3 = jax.block_until_ready(
        smooth_l1_loss({"rgb_coarse": a3, "rgb_fine": b3}, t3, max_tile_rows=16))
    ref3 = ref_smooth_l1(a3, t3) + ref_smooth_l1(b3, t3)
    assert jnp.allclose(loss3, ref3, rtol=1e-5, atol=1e-6), (loss3, ref3)

    # Mixed precision: bf16 preds vs f32 targets (dtype-aware alignment path).
    a4 = rgb_coarse.astype(jnp.bfloat16)
    loss4 = jax.block_until_ready(smooth_l1_loss({"rgb_coarse": a4}, targets))
    ref4 = ref_smooth_l1(a4, targets)
    assert jnp.allclose(loss4, ref4, rtol=1e-5, atol=1e-6), (loss4, ref4)

    print("KERNEL_OK")
</pallas_src>

<mosaic_0001>
module attributes {stable_mosaic.version = 11 : i64} {
  func.func @kernel(%arg0: i32, %arg1: i32, %arg2: memref<1x8x128xf32, #tpu.memory_space<vmem>>, %arg3: memref<1x8x128xf32, #tpu.memory_space<vmem>>, %arg4: memref<1x8x128xf32, #tpu.memory_space<vmem>>, %arg5: memref<1x1x1xf32, #tpu.memory_space<vmem>>, %arg6: memref<8x128xf32, #tpu.memory_space<vmem>>) attributes {dimension_semantics = [#tpu.dimension_semantics<parallel>, #tpu.dimension_semantics<arbitrary>], iteration_bounds = array<i64: 2, 1>, scalar_prefetch = 0 : i64, scratch_operands = 1 : i64, tpu.core_type = #tpu.core_type<tc>, window_params = [{transform_indices = @transform_0, window_bounds = array<i64: 1, 8, 128>}, {transform_indices = @transform_1, window_bounds = array<i64: 1, 8, 128>}, {transform_indices = @transform_2, window_bounds = array<i64: 1, 8, 128>}, {transform_indices = @transform_3, window_bounds = array<i64: 1, 1, 1>}]} {
    %c0_i32 = arith.constant 0 : i32
    %0 = arith.cmpi eq, %arg1, %c0_i32 : i32
    %1 = arith.extui %0 : i1 to i32
    %c0_i32_0 = arith.constant 0 : i32
    %2 = arith.cmpi ne, %1, %c0_i32_0 : i32
    scf.if %2 {
      %cst_23 = arith.constant 0.000000e+00 : f32
      %37 = vector.broadcast %cst_23 : f32 to vector<8x128xf32>
      %c0_24 = arith.constant 0 : index
      %c0_25 = arith.constant 0 : index
      %38 = vector.load %arg6[%c0_24, %c0_25] : memref<8x128xf32, #tpu.memory_space<vmem>>, vector<8x128xf32>
      tpu.vector_store %arg6[%c0_24, %c0_25], %37 {strides = array<i32>} : memref<8x128xf32, #tpu.memory_space<vmem>>, vector<8x128xf32>,
    } else {
    }
    %c0 = arith.constant 0 : index
    %c0_1 = arith.constant 0 : index
    %3 = vector.load %arg6[%c0, %c0_1] : memref<8x128xf32, #tpu.memory_space<vmem>>, vector<8x128xf32>
    %c0_2 = arith.constant 0 : index
    %c0_3 = arith.constant 0 : index
    %c0_4 = arith.constant 0 : index
    %4 = vector.load %arg4[%c0_2, %c0_3, %c0_4] : memref<1x8x128xf32, #tpu.memory_space<vmem>>, vector<1x8x128xf32>
    %cst = arith.constant 0.000000e+00 : f32
    %5 = vector.broadcast %cst : f32 to vector<8x128xf32>
    %c0_5 = arith.constant 0 : index
    %c0_6 = arith.constant 0 : index
    %c0_7 = arith.constant 0 : index
    %6 = vector.load %arg2[%c0_5, %c0_6, %c0_7] : memref<1x8x128xf32, #tpu.memory_space<vmem>>, vector<1x8x128xf32>
    %7 = arith.subf %6, %4 : vector<1x8x128xf32>
    %8 = math.absf %7 : vector<1x8x128xf32>
    %cst_8 = arith.constant 1.000000e+00 : f32
    %9 = vector.broadcast %cst_8 : f32 to vector<1x8x128xf32>
    %10 = arith.cmpf olt, %8, %9 : vector<1x8x128xf32>
    %cst_9 = arith.constant 5.000000e-01 : f32
    %11 = vector.broadcast %cst_9 : f32 to vector<1x8x128xf32>
    %12 = arith.mulf %11, %7 : vector<1x8x128xf32>
    %13 = arith.mulf %12, %7 : vector<1x8x128xf32>
    %cst_10 = arith.constant 5.000000e-01 : f32
    %14 = vector.broadcast %cst_10 : f32 to vector<1x8x128xf32>
    %15 = arith.subf %8, %14 : vector<1x8x128xf32>
    %16 = arith.select %10, %13, %15 : vector<1x8x128xi1>, vector<1x8x128xf32>
    %cst_11 = arith.constant dense<0.000000e+00> : vector<8x128xf32>
    %17 = vector.multi_reduction <add>, %16, %cst_11 [0] : vector<1x8x128xf32> to vector<8x128xf32>
    %18 = arith.addf %5, %17 : vector<8x128xf32>
    %c0_12 = arith.constant 0 : index
    %c0_13 = arith.constant 0 : index
    %c0_14 = arith.constant 0 : index
    %19 = vector.load %arg3[%c0_12, %c0_13, %c0_14] : memref<1x8x128xf32, #tpu.memory_space<vmem>>, vector<1x8x128xf32>
    %20 = arith.subf %19, %4 : vector<1x8x128xf32>
    %21 = math.absf %20 : vector<1x8x128xf32>
    %cst_15 = arith.constant 1.000000e+00 : f32
    %22 = vector.broadcast %cst_15 : f32 to vector<1x8x128xf32>
    %23 = arith.cmpf olt, %21, %22 : vector<1x8x128xf32>
    %cst_16 = arith.constant 5.000000e-01 : f32
    %24 = vector.broadcast %cst_16 : f32 to vector<1x8x128xf32>
    %25 = arith.mulf %24, %20 : vector<1x8x128xf32>
    %26 = arith.mulf %25, %20 : vector<1x8x128xf32>
    %cst_17 = arith.constant 5.000000e-01 : f32
    %27 = vector.broadcast %cst_17 : f32 to vector<1x8x128xf32>
    %28 = arith.subf %21, %27 : vector<1x8x128xf32>
    %29 = arith.select %23, %26, %28 : vector<1x8x128xi1>, vector<1x8x128xf32>
    %cst_18 = arith.constant dense<0.000000e+00> : vector<8x128xf32>
    %30 = vector.multi_reduction <add>, %29, %cst_18 [0] : vector<1x8x128xf32> to vector<8x128xf32>
    %31 = arith.addf %18, %30 : vector<8x128xf32>
    %32 = arith.addf %3, %31 : vector<8x128xf32>
    %c0_19 = arith.constant 0 : index
    %c0_20 = arith.constant 0 : index
    %33 = vector.load %arg6[%c0_19, %c0_20] : memref<8x128xf32, #tpu.memory_space<vmem>>, vector<8x128xf32>
    tpu.vector_store %arg6[%c0_19, %c0_20], %32 {strides = array<i32>} : memref<8x128xf32, #tpu.memory_space<vmem>>, vector<8x128xf32>,
    %c0_i32_21 = arith.constant 0 : i32
    %34 = arith.cmpi eq, %arg1, %c0_i32_21 : i32
    %35 = arith.extui %34 : i1 to i32
    %c0_i32_22 = arith.constant 0 : i32
    %36 = arith.cmpi ne, %35, %c0_i32_22 : i32
    scf.if %36 {
      %c0_23 = arith.constant 0 : index
      %c0_24 = arith.constant 0 : index
      %37 = vector.load %arg6[%c0_23, %c0_24] : memref<8x128xf32, #tpu.memory_space<vmem>>, vector<8x128xf32>
      %38 = vector.shape_cast %37 : vector<8x128xf32> to vector<1x8x128xf32>
      %cst_25 = arith.constant dense<0.000000e+00> : vector<1xf32>
      %39 = vector.multi_reduction <add>, %38, %cst_25 [1, 2] : vector<1x8x128xf32> to vector<1xf32>
      %40 = vector.shape_cast %39 : vector<1xf32> to vector<1x1x1xf32>
      %41 = vector.extract %40[0, 0, 0] : f32 from vector<1x1x1xf32>
      %42 = vector.broadcast %41 : f32 to vector<1x1x1xf32>
      %c0_26 = arith.constant 0 : index
      %c0_27 = arith.constant 0 : index
      %c0_28 = arith.constant 0 : index
      %43 = vector.load %arg5[%c0_26, %c0_27, %c0_28] : memref<1x1x1xf32, #tpu.memory_space<vmem>>, vector<1x1x1xf32>
      tpu.vector_store %arg5[%c0_26, %c0_27, %c0_28], %42 {strides = array<i32>} : memref<1x1x1xf32, #tpu.memory_space<vmem>>, vector<1x1x1xf32>,
    } else {
    }
    return
  }
  func.func @transform_0(%arg0: i32, %arg1: i32) -> (i32, i32, i32) {
    %c0_i32 = arith.constant 0 : i32
    %c0_i32_0 = arith.constant 0 : i32
    return %arg0, %arg1, %c0_i32 : i32, i32, i32
  }
  func.func @transform_1(%arg0: i32, %arg1: i32) -> (i32, i32, i32) {
    %c0_i32 = arith.constant 0 : i32
    %c0_i32_0 = arith.constant 0 : i32
    return %arg0, %arg1, %c0_i32 : i32, i32, i32
  }
  func.func @transform_2(%arg0: i32, %arg1: i32) -> (i32, i32, i32) {
    %c0_i32 = arith.constant 0 : i32
    %c0_i32_0 = arith.constant 0 : i32
    return %arg0, %arg1, %c0_i32 : i32, i32, i32
  }
  func.func @transform_3(%arg0: i32, %arg1: i32) -> (i32, i32, i32) {
    %c0_i32 = arith.constant 0 : i32
    %c0_i32_0 = arith.constant 0 : i32
    %c0_i32_1 = arith.constant 0 : i32
    return %arg0, %c0_i32, %c0_i32_0 : i32, i32, i32
  }
}

</mosaic_0001>

<bundles_post_ra>
// kernel: _fused_smooth_l1.1
= control target key start
LH: loop header
LB: loop body
LE: loop exit
PB: predicated region body
PF: predicated region fallthrough
CT: control target
= control target key end

     0   :  { %s458_s12 = smov 0   ;;  %s460_s13 = smov 0   ;;  %s501_s0 = inlined_call_operand.vmem [shape: f32[2,8,128], index: 0, kind: input, shape index: {}]   ;;  %s502_s1 = inlined_call_operand.vmem [shape: f32[2,8,128], index: 1, kind: input, shape index: {}]   ;;  %s503_s2 = inlined_call_operand.vmem [shape: f32[2,8,128], index: 2, kind: input, shape index: {}]   ;;  %s504_s3 = inlined_call_operand.vmem [shape: f32[2,1,1], index: 3, kind: output, shape index: {}]  }
   0x1   :  { %s462_s14 = smov 0  }
   0x2 LB: > { %s25_s15 = sadd.s32 1, %s432_s13  ;;  %p380_p0 = scmp.ge.s32.totalorder %s436_s14, 1  ;;  %s436_s14 = sphi %s462_s14, %s13_s14   ;;  %s432_s13 = sphi %s460_s13, %s506_s13   ;;  %s428_s12 = sphi %s458_s12, %s505_s12  }
   0x3   : > { %p27_p1 = scmp.ge.s32.totalorder %s25_s15, 2  ;;  %p181_p2 = scmp.lt.s32.totalorder %s436_s14, 3 }
   0x5   : > { %s508_s15 = smov (%p27_p1, %s25_s15), 0  ;;  %p182_p3 = pnand %p380_p0, %p181_p2 }
   0x6   : > { %p219_p4 = scmp.lt.s32.totalorder (!%p182_p3), %s428_s12, 1 }
   0x7   : > { %185 = sbr.rel (%p182_p3) target bundleno = 230 (0xe6), region = 32 }
   0xc   : > { %s510_s12 = smov (!%p219_p4, %s428_s12), 1  ;;  %vm286_vm2 = vcmask 0  }
   0xd   : > { %s381_s16 = sshll.u32 %s510_s12, 3  ;;  %s242_s28 = scalar_lea.vmem %s504_s3, %s510_s12 }
   0xe   : > { %s225_s19 = scalar_lea.vmem %s501_s0, %s381_s16  ;;  %s232_s22 = scalar_lea.vmem %s502_s1, %s381_s16 }
   0xf   : > { %s239_s25 = scalar_lea.vmem %s503_s2, %s381_s16  ;;  %v250_v0 = vld [vmem:[%s225_s19] sm:$0xff] }
  0x10   : > { %v260_v1 = vld [vmem:[%s232_s22] sm:$0xff] }
  0x11   : > { %v249_v2 = vld [vmem:[%s239_s25] sm:$0xff] }
  0x12   : > { %v251_v3 = vsub.f32 %v250_v0, %v249_v2  ;;  %v261_v4 = vsub.f32 %v260_v1, %v249_v2 }
  0x14   : > { %v252_v5 = vand.u32 2147483647, %v251_v3  ;;  %v254_v6 = vmul.f32 0.5, %v251_v3  ;;  %v262_v7 = vand.u32 2147483647, %v261_v4  ;;  %v264_v8 = vmul.f32 0.5, %v261_v4 }
  0x16   : > { %vm253_vm0 = vcmp.lt.f32.partialorder %v252_v5, 1.0  ;;  %v255_v9 = vmul.f32 %v254_v6, %v251_v3  ;;  %v384_v10 = vadd.f32 -0.5, %v252_v5  ;;  %vm263_vm1 = vcmp.lt.f32.partialorder %v262_v7, 1.0 }
  0x17   : > { %v265_v11 = vmul.f32 %v264_v8, %v261_v4  ;;  %v385_v12 = vadd.f32 -0.5, %v262_v7 }
  0x18   : > { %v257_v13 = vsel %vm253_vm0, %v255_v9, %v384_v10 }
  0x19   : > { %v267_v14 = vsel %vm263_vm1, %v265_v11, %v385_v12 }
  0x1a   : > { %v269_v15 = vadd.f32 %v267_v14, %v257_v13 }
  0x1c   : > { %276 = vadd.xlane.f32.xlu0 %v269_v15 }
  0xa5   : > { %v277_v16 = vpop.xlane.xlu0 %276 }
  0xa6   : > { %v278_v17 = vrot.slane %v277_v16, 4 }
  0xa8   : > { %v279_v18 = vadd.f32 %v278_v17, %v277_v16 }
  0xaa   : > { %v280_v19 = vrot.slane %v279_v18, 2 }
  0xac   : > { %v281_v20 = vadd.f32 %v280_v19, %v279_v18 }
  0xae   : > { %v282_v21 = vrot.slane %v281_v20, 1 }
  0xb0   : > { %v283_v22 = vadd.f32 %v282_v21, %v281_v20 }
  0xb2   : > { %388 = vpush %v283_v22 }
  0xe3   : > { %s389_s29 = spop %388 }
  0xe4   : > { %v285_v23 = vstv %s389_s29 }
  0xe5   : > { %287 = vst.msk [vmem:[%s242_s28] sm:$0x1] %vm286_vm2, %v285_v23 }
  0xe6 PF: > { %s13_s14 = sadd.s32 1, %s436_s14   ;;  %s505_s12 = smov %s432_s13 }
  0xe7   : > { %p10_p5 = scmp.ge.s32.totalorder %s13_s14, 4   ;;  %s506_s13 = smov %s508_s15 }
  0xe9   :  { %12 = sbr.rel (!%p10_p5) target bundleno = 2 (0x2), region = 76 }

</bundles_post_ra>
